<compile_context>
chip_gen: v7x
topology: tpu7x:2x2x1
jax: 0.10.0
libtpu: 0.0.40
codegen_flags: <defaults>
</compile_context>

<pallas_src>
import functools

import jax
import jax.numpy as jnp
from jax.experimental import pallas as pl
from jax.experimental.pallas import tpu as pltpu


_TAPS = tuple((dy, dx) for dy in (-1, 0, 1) for dx in (-1, 0, 1))


def _round_up(x, m):
    return (x + m - 1) // m * m


# ---------------------------------------------------------------------------
# Pallas kernels
# ---------------------------------------------------------------------------
def _conv3x3_big_k_dot(act, masks, wmat, *, wp):
    """3x3 'same' conv of one (Cp, HW) tile as a single big-K MXU dot.

    act   : (Cp, HW) bf16, HW = Hp*Wp flattened with W fastest (lane dim).
    masks : (9, HW)  bf16 {0,1}; row t zeroes the out-of-image positions of
            tap t — this *is* the Conv2d zero padding, applied to `act`
            (i.e. after anything already folded into `act`, e.g. BN+ReLU).
    wmat  : (Coutp, 9*Cp) bf16, column index = (ky*3+kx)*Cp + c.
    Returns the f32 (Coutp, HW) accumulator.
    """
    taps = []
    for t, (dy, dx) in enumerate(_TAPS):
        off = dy * wp + dx
        # shifted[p] = act[p + off] (wrapped lanes are zeroed by the mask).
        # TODO(synk): pltpu.roll would do this as a single XLU rotate.
        shifted = act if off == 0 else jnp.roll(act, -off, axis=-1)
        taps.append(shifted * masks[t:t + 1, :])
    # Cp is padded to the bf16 tile height (16) by the wrapper, so this
    # sublane concatenation is tile-aligned.
    patches = jnp.concatenate(taps, axis=0)               # (9*Cp, HW) bf16
    return jnp.dot(wmat, patches, preferred_element_type=jnp.float32)


def _emit_out_and_stats(acc, y_ref, st_ref, cout):
    """Store the bf16 conv tile + per-channel f32 [sum, sum-of-squares]."""
    y = acc.astype(y_ref.dtype)                            # (Coutp, HW) bf16
    y_ref[0] = y
    y32 = y[:cout].astype(jnp.float32)   # stats of what BN will actually see
    st_ref[0] = jnp.concatenate(
        [jnp.sum(y32, axis=1, keepdims=True),
         jnp.sum(y32 * y32, axis=1, keepdims=True)], axis=1)


def _conv_stats_kernel(x_ref, m_ref, w_ref, y_ref, st_ref, *, wp, cout):
    acc = _conv3x3_big_k_dot(x_ref[0], m_ref[...], w_ref[...], wp=wp)
    _emit_out_and_stats(acc, y_ref, st_ref, cout)


def _bn_relu_conv_stats_kernel(x_ref, sc_ref, sh_ref, m_ref, w_ref,
                               y_ref, st_ref, *, wp, cout):
    # BN1-apply + ReLU fused into the conv2 prologue (f32 VPU math).  The
    # padded channels of x have scale = shift = 0, so they stay exactly 0.
    z = jnp.maximum(
        x_ref[0].astype(jnp.float32) * sc_ref[...] + sh_ref[...], 0.0)
    acc = _conv3x3_big_k_dot(z.astype(x_ref.dtype), m_ref[...], w_ref[...],
                             wp=wp)
    _emit_out_and_stats(acc, y_ref, st_ref, cout)


def _bn_relu_kernel(y_ref, sc_ref, sh_ref, o_ref, *, cout):
    y = y_ref[0][:cout].astype(jnp.float32)
    o_ref[0] = jnp.maximum(
        y * sc_ref[...] + sh_ref[...], 0.0).astype(o_ref.dtype)


# ---------------------------------------------------------------------------
# pallas_call wrappers
# ---------------------------------------------------------------------------
def _vmem_limit_bytes():
    """~3/4 of the chip's VMEM: lets v6e go past 64 MiB, v7x uses ~48 MiB."""
    try:
        cap = int(pltpu.get_tpu_info().vmem_capacity_bytes)
    except Exception:
        cap = 64 * 1024 * 1024
    return (cap // 4) * 3


def _conv_call(act, masks, wmat, *, wp, cout, scale=None, shift=None,
               vmem_limit):
    n, cinp, hw = act.shape
    coutp, k = wmat.shape
    assert k == 9 * cinp, (k, cinp)
    affine = scale is not None
    kern = functools.partial(
        _bn_relu_conv_stats_kernel if affine else _conv_stats_kernel,
        wp=wp, cout=cout)

    in_specs = [pl.BlockSpec((1, cinp, hw), lambda b: (b, 0, 0))]
    args = [act]
    if affine:
        in_specs.append(pl.BlockSpec((cinp, 1), lambda b: (0, 0)))
        in_specs.append(pl.BlockSpec((cinp, 1), lambda b: (0, 0)))
        args += [scale, shift]
    in_specs.append(pl.BlockSpec((9, hw), lambda b: (0, 0)))
    in_specs.append(pl.BlockSpec((coutp, k), lambda b: (0, 0)))
    args += [masks, wmat]

    return pl.pallas_call(
        kern,
        grid=(n,),
        in_specs=in_specs,
        out_specs=(pl.BlockSpec((1, coutp, hw), lambda b: (b, 0, 0)),
                   pl.BlockSpec((1, cout, 2), lambda b: (b, 0, 0))),
        out_shape=(jax.ShapeDtypeStruct((n, coutp, hw), act.dtype),
                   jax.ShapeDtypeStruct((n, cout, 2), jnp.float32)),
        compiler_params=pltpu.CompilerParams(
            dimension_semantics=("parallel",),
            vmem_limit_bytes=vmem_limit),
    )(*args)


def _bn_relu_call(y, scale, shift, *, cout, vmem_limit):
    n, cp, hw = y.shape
    return pl.pallas_call(
        functools.partial(_bn_relu_kernel, cout=cout),
        grid=(n,),
        in_specs=[pl.BlockSpec((1, cp, hw), lambda b: (b, 0, 0)),
                  pl.BlockSpec((cout, 1), lambda b: (0, 0)),
                  pl.BlockSpec((cout, 1), lambda b: (0, 0))],
        out_specs=pl.BlockSpec((1, cout, hw), lambda b: (b, 0, 0)),
        out_shape=jax.ShapeDtypeStruct((n, cout, hw), jnp.float32),
        compiler_params=pltpu.CompilerParams(
            dimension_semantics=("parallel",),
            vmem_limit_bytes=vmem_limit),
    )(y, scale, shift)


# ---------------------------------------------------------------------------
# Layout / glue helpers (plain JAX; tiny, fuse under jit)
# ---------------------------------------------------------------------------
def _tap_masks(hp, wp, dtype):
    """(9, Hp*Wp) {0,1} masks: mask[t, p] == tap t of position p is in-image."""
    h = jnp.arange(hp)
    w = jnp.arange(wp)
    rows = []
    for dy, dx in _TAPS:
        mh = ((h + dy) >= 0) & ((h + dy) < hp)
        mw = ((w + dx) >= 0) & ((w + dx) < wp)
        rows.append((mh[:, None] & mw[None, :]).reshape(-1))
    return jnp.stack(rows).astype(dtype)


def _conv_weight_matrix(w_oihw, cinp, coutp, dtype):
    """(O, I, 3, 3) -> (Coutp, 9*Cinp) with column = (ky*3+kx)*Cinp + c."""
    o, i = w_oihw.shape[:2]
    wm = jnp.transpose(w_oihw, (0, 2, 3, 1))                 # (o, ky, kx, i)
    wm = jnp.pad(wm, ((0, coutp - o), (0, 0), (0, 0), (0, cinp - i)))
    return wm.reshape(coutp, 9 * cinp).astype(dtype)


def _bn_scale_shift(stats, gamma, beta, count, eps):
    """Reduce per-batch-item partials -> folded per-channel scale/shift."""
    s = jnp.sum(stats[:, :, 0], axis=0)           # (cout,)
    q = jnp.sum(stats[:, :, 1], axis=0)
    mean = s / count
    var = q / count - mean * mean                 # biased var (train mode)
    inv = jax.lax.rsqrt(var + eps)
    scale = gamma.astype(jnp.float32) * inv
    shift = beta.astype(jnp.float32) - mean * scale
    return scale.reshape(-1, 1), shift.reshape(-1, 1)


# ---------------------------------------------------------------------------
# Down forward: MaxPool2d(2) -> Conv3x3 -> BN -> ReLU -> Conv3x3 -> BN -> ReLU
# ---------------------------------------------------------------------------
def down_forward(x_nchw, params, *, eps=1e-5, compute_dtype=jnp.bfloat16):
    w1, g1, b1, w2, g2, b2 = params
    n, cin, h, w = x_nchw.shape
    cout = w1.shape[0]
    hp, wp = h // 2, w // 2
    hw = hp * wp
    vmem_limit = _vmem_limit_bytes()

    # Channel dims padded to the bf16 packed-tile height (16) -> every
    # in-kernel sublane concat is tile-aligned; free for real UNet channels.
    cinp = _round_up(cin, 16)
    coutp = _round_up(cout, 16)

    # Rough single-tile working set (act/y double-buffered + taps/patches +
    # f32 accumulator + resident weights).
    per_step = hw * (4 * (cinp + coutp) + 36 * cinp + 8 * coutp)
    per_step += 4 * coutp * 9 * max(cinp, coutp) + 18 * hw
    if per_step > vmem_limit:
        raise ValueError(
            f"working set {per_step} B exceeds VMEM budget {vmem_limit} B; "
            "HW row-tiling with halo is not implemented (see TODO).")

    # --- MaxPool2d(2) -> bf16, channel-padded, HW-flattened ---------------
    # TODO(synk): fuse the 2x2 pool into the conv1 kernel so xp never
    # round-trips HBM (minor: xp is only ~1/4 of x).
    xp = x_nchw.reshape(n, cin, hp, 2, wp, 2).max(axis=(3, 5))
    xp = jnp.pad(xp.reshape(n, cin, hw),
                 ((0, 0), (0, cinp - cin), (0, 0))).astype(compute_dtype)

    masks = _tap_masks(hp, wp, compute_dtype)                 # (9, hw)
    wm1 = _conv_weight_matrix(w1, cinp, coutp, compute_dtype)   # (coutp, 9*cinp)
    wm2 = _conv_weight_matrix(w2, coutp, coutp, compute_dtype)  # (coutp, 9*coutp)

    # --- Conv1 (in-kernel im2col) + BN1 partial statistics ----------------
    y1, st1 = _conv_call(xp, masks, wm1, wp=wp, cout=cout,
                         vmem_limit=vmem_limit)
    sc1, sh1 = _bn_scale_shift(st1, g1, b1, n * hw, eps)        # (cout, 1)

    # --- BN1-apply + ReLU fused into Conv2 + BN2 partial statistics -------
    chan_pad = ((0, coutp - cout), (0, 0))
    y2, st2 = _conv_call(y1, masks, wm2, wp=wp, cout=cout,
                         scale=jnp.pad(sc1, chan_pad),
                         shift=jnp.pad(sh1, chan_pad),
                         vmem_limit=vmem_limit)
    sc2, sh2 = _bn_scale_shift(st2, g2, b2, n * hw, eps)

    # --- BN2-apply + ReLU -> f32 NCHW output -------------------------------
    out = _bn_relu_call(y2, sc2, sh2, cout=cout, vmem_limit=vmem_limit)
    return out.reshape(n, cout, hp, wp)


# ---------------------------------------------------------------------------
# Pure-JAX reference (PyTorch train-mode semantics; mirrors the kernel path's
# mixed precision: bf16 conv operands / activations, f32 accumulation & BN).
# ---------------------------------------------------------------------------
def _reference_down(x, params, *, eps=1e-5, compute_dtype=jnp.bfloat16):
    w1, g1, b1, w2, g2, b2 = params
    n, c, h, w = x.shape
    xp = x.reshape(n, c, h // 2, 2, w // 2, 2).max(axis=(3, 5))
    xp = xp.astype(compute_dtype)

    def conv(v, wt):
        return jax.lax.conv_general_dilated(
            v.astype(compute_dtype), wt.astype(compute_dtype),
            window_strides=(1, 1), padding="SAME",
            dimension_numbers=("NCHW", "OIHW", "NCHW"),
            preferred_element_type=jnp.float32)

    def bn_relu(y, g, b):
        # BN sees the bf16-rounded conv output (as in the kernel path);
        # statistics and normalization math are f32.
        y = y.astype(compute_dtype).astype(jnp.float32)
        mean = y.mean(axis=(0, 2, 3), keepdims=True)
        var = (y * y).mean(axis=(0, 2, 3), keepdims=True) - mean ** 2
        z = (y - mean) * jax.lax.rsqrt(var + eps)
        return jnp.maximum(z * g.reshape(1, -1, 1, 1) + b.reshape(1, -1, 1, 1),
                           0.0)

    z1 = bn_relu(conv(xp, w1), g1, b1)
    return bn_relu(conv(z1, w2), g2, b2)


if __name__ == "__main__":
    key = jax.random.PRNGKey(0)
    n, cin, cout, h, w = 2, 4, 8, 16, 16

    k_x, k_w1, k_w2, k_g1, k_b1, k_g2, k_b2 = jax.random.split(key, 7)
    x = jax.random.normal(k_x, (n, cin, h, w), jnp.float32)

    # Shapes match nn.Conv2d(cin, cout, 3, padding=1, bias=False) / BatchNorm2d.
    w1 = 0.2 * jax.random.normal(k_w1, (cout, cin, 3, 3), jnp.float32)
    w2 = 0.2 * jax.random.normal(k_w2, (cout, cout, 3, 3), jnp.float32)
    g1 = 1.0 + 0.1 * jax.random.normal(k_g1, (cout,), jnp.float32)
    b1 = 0.1 * jax.random.normal(k_b1, (cout,), jnp.float32)
    g2 = 1.0 + 0.1 * jax.random.normal(k_g2, (cout,), jnp.float32)
    b2 = 0.1 * jax.random.normal(k_b2, (cout,), jnp.float32)
    params = (w1, g1, b1, w2, g2, b2)

    fwd = jax.jit(down_forward)
    out = jax.block_until_ready(fwd(x, params))
    ref = jax.block_until_ready(_reference_down(x, params))

    assert out.shape == (n, cout, h // 2, w // 2), out.shape
    max_err = float(jnp.max(jnp.abs(out - ref)))
    assert jnp.allclose(out, ref, atol=1e-2, rtol=1e-2), max_err
    print("KERNEL_OK")
</pallas_src>

<mosaic_0001>
module attributes {stable_mosaic.version = 11 : i64} {
  func.func @_conv_stats_kernel(%arg0: i32, %arg1: memref<1x16x64xbf16, #tpu.memory_space<vmem>>, %arg2: memref<9x64xbf16, #tpu.memory_space<vmem>>, %arg3: memref<16x144xbf16, #tpu.memory_space<vmem>>, %arg4: memref<1x16x64xbf16, #tpu.memory_space<vmem>>, %arg5: memref<1x8x2xf32, #tpu.memory_space<vmem>>) attributes {dimension_semantics = [#tpu.dimension_semantics<parallel>], iteration_bounds = array<i64: 2>, scalar_prefetch = 0 : i64, scratch_operands = 0 : i64, tpu.core_type = #tpu.core_type<tc>, window_params = [{transform_indices = @transform_0, window_bounds = array<i64: 1, 16, 64>}, {pipeline_mode = #tpu.pipeline_mode<synchronous>, transform_indices = @transform_1, window_bounds = array<i64: 9, 64>}, {pipeline_mode = #tpu.pipeline_mode<synchronous>, transform_indices = @transform_2, window_bounds = array<i64: 16, 144>}, {transform_indices = @transform_3, window_bounds = array<i64: 1, 16, 64>}, {transform_indices = @transform_4, window_bounds = array<i64: 1, 8, 2>}]} {
    %c0 = arith.constant 0 : index
    %c0_0 = arith.constant 0 : index
    %c0_1 = arith.constant 0 : index
    %0 = vector.load %arg1[%c0, %c0_0, %c0_1] : memref<1x16x64xbf16, #tpu.memory_space<vmem>>, vector<1x16x64xbf16>
    %1 = vector.shape_cast %0 : vector<1x16x64xbf16> to vector<16x64xbf16>
    %c0_2 = arith.constant 0 : index
    %c0_3 = arith.constant 0 : index
    %2 = vector.load %arg2[%c0_2, %c0_3] : memref<9x64xbf16, #tpu.memory_space<vmem>>, vector<9x64xbf16>
    %c0_4 = arith.constant 0 : index
    %c0_5 = arith.constant 0 : index
    %3 = vector.load %arg3[%c0_4, %c0_5] : memref<16x144xbf16, #tpu.memory_space<vmem>>, vector<16x144xbf16>
    %4 = vector.extract_strided_slice %1 {offsets = [0, 55], sizes = [16, 9], strides = [1, 1]} : vector<16x64xbf16> to vector<16x9xbf16>
    %5 = vector.extract_strided_slice %1 {offsets = [0, 0], sizes = [16, 55], strides = [1, 1]} : vector<16x64xbf16> to vector<16x55xbf16>
    %6 = tpu.concatenate %4, %5 in 1 : vector<16x9xbf16>, vector<16x55xbf16> -> vector<16x64xbf16>
    %7 = vector.extract_strided_slice %2 {offsets = [0, 0], sizes = [1, 64], strides = [1, 1]} : vector<9x64xbf16> to vector<1x64xbf16>
    %8 = vector.broadcast %7 : vector<1x64xbf16> to vector<16x64xbf16>
    %9 = arith.mulf %6, %8 : vector<16x64xbf16>
    %10 = vector.extract_strided_slice %1 {offsets = [0, 56], sizes = [16, 8], strides = [1, 1]} : vector<16x64xbf16> to vector<16x8xbf16>
    %11 = vector.extract_strided_slice %1 {offsets = [0, 0], sizes = [16, 56], strides = [1, 1]} : vector<16x64xbf16> to vector<16x56xbf16>
    %12 = tpu.concatenate %10, %11 in 1 : vector<16x8xbf16>, vector<16x56xbf16> -> vector<16x64xbf16>
    %13 = vector.extract_strided_slice %2 {offsets = [1, 0], sizes = [1, 64], strides = [1, 1]} : vector<9x64xbf16> to vector<1x64xbf16>
    %14 = vector.broadcast %13 : vector<1x64xbf16> to vector<16x64xbf16>
    %15 = arith.mulf %12, %14 : vector<16x64xbf16>
    %16 = vector.extract_strided_slice %1 {offsets = [0, 57], sizes = [16, 7], strides = [1, 1]} : vector<16x64xbf16> to vector<16x7xbf16>
    %17 = vector.extract_strided_slice %1 {offsets = [0, 0], sizes = [16, 57], strides = [1, 1]} : vector<16x64xbf16> to vector<16x57xbf16>
    %18 = tpu.concatenate %16, %17 in 1 : vector<16x7xbf16>, vector<16x57xbf16> -> vector<16x64xbf16>
    %19 = vector.extract_strided_slice %2 {offsets = [2, 0], sizes = [1, 64], strides = [1, 1]} : vector<9x64xbf16> to vector<1x64xbf16>
    %20 = vector.broadcast %19 : vector<1x64xbf16> to vector<16x64xbf16>
    %21 = arith.mulf %18, %20 : vector<16x64xbf16>
    %22 = vector.extract_strided_slice %1 {offsets = [0, 63], sizes = [16, 1], strides = [1, 1]} : vector<16x64xbf16> to vector<16x1xbf16>
    %23 = vector.extract_strided_slice %1 {offsets = [0, 0], sizes = [16, 63], strides = [1, 1]} : vector<16x64xbf16> to vector<16x63xbf16>
    %24 = tpu.concatenate %22, %23 in 1 : vector<16x1xbf16>, vector<16x63xbf16> -> vector<16x64xbf16>
    %25 = vector.extract_strided_slice %2 {offsets = [3, 0], sizes = [1, 64], strides = [1, 1]} : vector<9x64xbf16> to vector<1x64xbf16>
    %26 = vector.broadcast %25 : vector<1x64xbf16> to vector<16x64xbf16>
    %27 = arith.mulf %24, %26 : vector<16x64xbf16>
    %28 = vector.extract_strided_slice %2 {offsets = [4, 0], sizes = [1, 64], strides = [1, 1]} : vector<9x64xbf16> to vector<1x64xbf16>
    %29 = vector.broadcast %28 : vector<1x64xbf16> to vector<16x64xbf16>
    %30 = arith.mulf %1, %29 : vector<16x64xbf16>
    %31 = vector.extract_strided_slice %1 {offsets = [0, 1], sizes = [16, 63], strides = [1, 1]} : vector<16x64xbf16> to vector<16x63xbf16>
    %32 = vector.extract_strided_slice %1 {offsets = [0, 0], sizes = [16, 1], strides = [1, 1]} : vector<16x64xbf16> to vector<16x1xbf16>
    %33 = tpu.concatenate %31, %32 in 1 : vector<16x63xbf16>, vector<16x1xbf16> -> vector<16x64xbf16>
    %34 = vector.extract_strided_slice %2 {offsets = [5, 0], sizes = [1, 64], strides = [1, 1]} : vector<9x64xbf16> to vector<1x64xbf16>
    %35 = vector.broadcast %34 : vector<1x64xbf16> to vector<16x64xbf16>
    %36 = arith.mulf %33, %35 : vector<16x64xbf16>
    %37 = vector.extract_strided_slice %1 {offsets = [0, 7], sizes = [16, 57], strides = [1, 1]} : vector<16x64xbf16> to vector<16x57xbf16>
    %38 = vector.extract_strided_slice %1 {offsets = [0, 0], sizes = [16, 7], strides = [1, 1]} : vector<16x64xbf16> to vector<16x7xbf16>
    %39 = tpu.concatenate %37, %38 in 1 : vector<16x57xbf16>, vector<16x7xbf16> -> vector<16x64xbf16>
    %40 = vector.extract_strided_slice %2 {offsets = [6, 0], sizes = [1, 64], strides = [1, 1]} : vector<9x64xbf16> to vector<1x64xbf16>
    %41 = vector.broadcast %40 : vector<1x64xbf16> to vector<16x64xbf16>
    %42 = arith.mulf %39, %41 : vector<16x64xbf16>
    %43 = vector.extract_strided_slice %1 {offsets = [0, 8], sizes = [16, 56], strides = [1, 1]} : vector<16x64xbf16> to vector<16x56xbf16>
    %44 = vector.extract_strided_slice %1 {offsets = [0, 0], sizes = [16, 8], strides = [1, 1]} : vector<16x64xbf16> to vector<16x8xbf16>
    %45 = tpu.concatenate %43, %44 in 1 : vector<16x56xbf16>, vector<16x8xbf16> -> vector<16x64xbf16>
    %46 = vector.extract_strided_slice %2 {offsets = [7, 0], sizes = [1, 64], strides = [1, 1]} : vector<9x64xbf16> to vector<1x64xbf16>
    %47 = vector.broadcast %46 : vector<1x64xbf16> to vector<16x64xbf16>
    %48 = arith.mulf %45, %47 : vector<16x64xbf16>
    %49 = vector.extract_strided_slice %1 {offsets = [0, 9], sizes = [16, 55], strides = [1, 1]} : vector<16x64xbf16> to vector<16x55xbf16>
    %50 = vector.extract_strided_slice %1 {offsets = [0, 0], sizes = [16, 9], strides = [1, 1]} : vector<16x64xbf16> to vector<16x9xbf16>
    %51 = tpu.concatenate %49, %50 in 1 : vector<16x55xbf16>, vector<16x9xbf16> -> vector<16x64xbf16>
    %52 = vector.extract_strided_slice %2 {offsets = [8, 0], sizes = [1, 64], strides = [1, 1]} : vector<9x64xbf16> to vector<1x64xbf16>
    %53 = vector.broadcast %52 : vector<1x64xbf16> to vector<16x64xbf16>
    %54 = arith.mulf %51, %53 : vector<16x64xbf16>
    %55 = tpu.concatenate %9, %15, %21, %27, %30, %36, %42, %48, %54 in 0 : vector<16x64xbf16>, vector<16x64xbf16>, vector<16x64xbf16>, vector<16x64xbf16>, vector<16x64xbf16>, vector<16x64xbf16>, vector<16x64xbf16>, vector<16x64xbf16>, vector<16x64xbf16> -> vector<144x64xbf16>
    %cst = arith.constant dense<0.000000e+00> : vector<16x64xf32>
    %56 = tpu.matmul %3, %55, %cst {dimension_numbers = #tpu.dot_dimension_numbers<[1], [0], [0], [1], [0, 0, 1, 1], [], []>} : vector<16x144xbf16>, vector<144x64xbf16>, vector<16x64xf32> -> vector<16x64xf32>
    %57 = arith.truncf %56 : vector<16x64xf32> to vector<16x64xbf16>
    %c0_6 = arith.constant 0 : index
    %c0_7 = arith.constant 0 : index
    %c0_8 = arith.constant 0 : index
    %58 = vector.load %arg4[%c0_6, %c0_7, %c0_8] : memref<1x16x64xbf16, #tpu.memory_space<vmem>>, vector<1x16x64xbf16>
    %59 = vector.shape_cast %58 : vector<1x16x64xbf16> to vector<16x64xbf16>
    %60 = vector.shape_cast %57 : vector<16x64xbf16> to vector<1x16x64xbf16>
    tpu.vector_store %arg4[%c0_6, %c0_7, %c0_8], %60 {strides = array<i32>} : memref<1x16x64xbf16, #tpu.memory_space<vmem>>, vector<1x16x64xbf16>,
    %61 = vector.extract_strided_slice %57 {offsets = [0, 0], sizes = [8, 64], strides = [1, 1]} : vector<16x64xbf16> to vector<8x64xbf16>
    %62 = arith.extf %61 : vector<8x64xbf16> to vector<8x64xf32>
    %cst_9 = arith.constant dense<0.000000e+00> : vector<8xf32>
    %63 = vector.multi_reduction <add>, %62, %cst_9 [1] : vector<8x64xf32> to vector<8xf32>
    %64 = vector.shape_cast %63 : vector<8xf32> to vector<8x1xf32>
    %65 = arith.mulf %62, %62 : vector<8x64xf32>
    %cst_10 = arith.constant dense<0.000000e+00> : vector<8xf32>
    %66 = vector.multi_reduction <add>, %65, %cst_10 [1] : vector<8x64xf32> to vector<8xf32>
    %67 = vector.shape_cast %66 : vector<8xf32> to vector<8x1xf32>
    %68 = tpu.concatenate %64, %67 in 1 : vector<8x1xf32>, vector<8x1xf32> -> vector<8x2xf32>
    %c0_11 = arith.constant 0 : index
    %c0_12 = arith.constant 0 : index
    %c0_13 = arith.constant 0 : index
    %69 = vector.load %arg5[%c0_11, %c0_12, %c0_13] : memref<1x8x2xf32, #tpu.memory_space<vmem>>, vector<1x8x2xf32>
    %70 = vector.shape_cast %69 : vector<1x8x2xf32> to vector<8x2xf32>
    %71 = vector.shape_cast %68 : vector<8x2xf32> to vector<1x8x2xf32>
    tpu.vector_store %arg5[%c0_11, %c0_12, %c0_13], %71 {strides = array<i32>} : memref<1x8x2xf32, #tpu.memory_space<vmem>>, vector<1x8x2xf32>,
    return
  }
  func.func @transform_0(%arg0: i32) -> (i32, i32, i32) {
    %c0_i32 = arith.constant 0 : i32
    %c0_i32_0 = arith.constant 0 : i32
    %c0_i32_1 = arith.constant 0 : i32
    return %arg0, %c0_i32, %c0_i32_0 : i32, i32, i32
  }
  func.func @transform_1(%arg0: i32) -> (i32, i32) {
    %c0_i32 = arith.constant 0 : i32
    %c0_i32_0 = arith.constant 0 : i32
    %c0_i32_1 = arith.constant 0 : i32
    return %c0_i32, %c0_i32_0 : i32, i32
  }
  func.func @transform_2(%arg0: i32) -> (i32, i32) {
    %c0_i32 = arith.constant 0 : i32
    %c0_i32_0 = arith.constant 0 : i32
    %c0_i32_1 = arith.constant 0 : i32
    return %c0_i32, %c0_i32_0 : i32, i32
  }
  func.func @transform_3(%arg0: i32) -> (i32, i32, i32) {
    %c0_i32 = arith.constant 0 : i32
    %c0_i32_0 = arith.constant 0 : i32
    %c0_i32_1 = arith.constant 0 : i32
    return %arg0, %c0_i32, %c0_i32_0 : i32, i32, i32
  }
  func.func @transform_4(%arg0: i32) -> (i32, i32, i32) {
    %c0_i32 = arith.constant 0 : i32
    %c0_i32_0 = arith.constant 0 : i32
    %c0_i32_1 = arith.constant 0 : i32
    return %arg0, %c0_i32, %c0_i32_0 : i32, i32, i32
  }
}

module attributes {stable_mosaic.version = 11 : i64} {
  func.func @_bn_relu_conv_stats_kernel(%arg0: i32, %arg1: memref<1x16x64xbf16, #tpu.memory_space<vmem>>, %arg2: memref<16x1xf32, #tpu.memory_space<vmem>>, %arg3: memref<16x1xf32, #tpu.memory_space<vmem>>, %arg4: memref<9x64xbf16, #tpu.memory_space<vmem>>, %arg5: memref<16x144xbf16, #tpu.memory_space<vmem>>, %arg6: memref<1x16x64xbf16, #tpu.memory_space<vmem>>, %arg7: memref<1x8x2xf32, #tpu.memory_space<vmem>>) attributes {dimension_semantics = [#tpu.dimension_semantics<parallel>], iteration_bounds = array<i64: 2>, scalar_prefetch = 0 : i64, scratch_operands = 0 : i64, tpu.core_type = #tpu.core_type<tc>, window_params = [{transform_indices = @transform_0, window_bounds = array<i64: 1, 16, 64>}, {pipeline_mode = #tpu.pipeline_mode<synchronous>, transform_indices = @transform_1, window_bounds = array<i64: 16, 1>}, {pipeline_mode = #tpu.pipeline_mode<synchronous>, transform_indices = @transform_2, window_bounds = array<i64: 16, 1>}, {pipeline_mode = #tpu.pipeline_mode<synchronous>, transform_indices = @transform_3, window_bounds = array<i64: 9, 64>}, {pipeline_mode = #tpu.pipeline_mode<synchronous>, transform_indices = @transform_4, window_bounds = array<i64: 16, 144>}, {transform_indices = @transform_5, window_bounds = array<i64: 1, 16, 64>}, {transform_indices = @transform_6, window_bounds = array<i64: 1, 8, 2>}]} {
    %c0 = arith.constant 0 : index
    %c0_0 = arith.constant 0 : index
    %c0_1 = arith.constant 0 : index
    %0 = vector.load %arg1[%c0, %c0_0, %c0_1] : memref<1x16x64xbf16, #tpu.memory_space<vmem>>, vector<1x16x64xbf16>
    %1 = vector.shape_cast %0 : vector<1x16x64xbf16> to vector<16x64xbf16>
    %2 = arith.extf %1 : vector<16x64xbf16> to vector<16x64xf32>
    %c0_2 = arith.constant 0 : index
    %c0_3 = arith.constant 0 : index
    %3 = vector.load %arg2[%c0_2, %c0_3] : memref<16x1xf32, #tpu.memory_space<vmem>>, vector<16x1xf32>
    %4 = vector.broadcast %3 : vector<16x1xf32> to vector<16x64xf32>
    %5 = arith.mulf %2, %4 : vector<16x64xf32>
    %c0_4 = arith.constant 0 : index
    %c0_5 = arith.constant 0 : index
    %6 = vector.load %arg3[%c0_4, %c0_5] : memref<16x1xf32, #tpu.memory_space<vmem>>, vector<16x1xf32>
    %7 = vector.broadcast %6 : vector<16x1xf32> to vector<16x64xf32>
    %8 = arith.addf %5, %7 : vector<16x64xf32>
    %cst = arith.constant 0.000000e+00 : f32
    %9 = vector.broadcast %cst : f32 to vector<16x64xf32>
    %10 = arith.maximumf %8, %9 : vector<16x64xf32>
    %11 = arith.truncf %10 : vector<16x64xf32> to vector<16x64xbf16>
    %c0_6 = arith.constant 0 : index
    %c0_7 = arith.constant 0 : index
    %12 = vector.load %arg4[%c0_6, %c0_7] : memref<9x64xbf16, #tpu.memory_space<vmem>>, vector<9x64xbf16>
    %c0_8 = arith.constant 0 : index
    %c0_9 = arith.constant 0 : index
    %13 = vector.load %arg5[%c0_8, %c0_9] : memref<16x144xbf16, #tpu.memory_space<vmem>>, vector<16x144xbf16>
    %14 = vector.extract_strided_slice %11 {offsets = [0, 55], sizes = [16, 9], strides = [1, 1]} : vector<16x64xbf16> to vector<16x9xbf16>
    %15 = vector.extract_strided_slice %11 {offsets = [0, 0], sizes = [16, 55], strides = [1, 1]} : vector<16x64xbf16> to vector<16x55xbf16>
    %16 = tpu.concatenate %14, %15 in 1 : vector<16x9xbf16>, vector<16x55xbf16> -> vector<16x64xbf16>
    %17 = vector.extract_strided_slice %12 {offsets = [0, 0], sizes = [1, 64], strides = [1, 1]} : vector<9x64xbf16> to vector<1x64xbf16>
    %18 = vector.broadcast %17 : vector<1x64xbf16> to vector<16x64xbf16>
    %19 = arith.mulf %16, %18 : vector<16x64xbf16>
    %20 = vector.extract_strided_slice %11 {offsets = [0, 56], sizes = [16, 8], strides = [1, 1]} : vector<16x64xbf16> to vector<16x8xbf16>
    %21 = vector.extract_strided_slice %11 {offsets = [0, 0], sizes = [16, 56], strides = [1, 1]} : vector<16x64xbf16> to vector<16x56xbf16>
    %22 = tpu.concatenate %20, %21 in 1 : vector<16x8xbf16>, vector<16x56xbf16> -> vector<16x64xbf16>
    %23 = vector.extract_strided_slice %12 {offsets = [1, 0], sizes = [1, 64], strides = [1, 1]} : vector<9x64xbf16> to vector<1x64xbf16>
    %24 = vector.broadcast %23 : vector<1x64xbf16> to vector<16x64xbf16>
    %25 = arith.mulf %22, %24 : vector<16x64xbf16>
    %26 = vector.extract_strided_slice %11 {offsets = [0, 57], sizes = [16, 7], strides = [1, 1]} : vector<16x64xbf16> to vector<16x7xbf16>
    %27 = vector.extract_strided_slice %11 {offsets = [0, 0], sizes = [16, 57], strides = [1, 1]} : vector<16x64xbf16> to vector<16x57xbf16>
    %28 = tpu.concatenate %26, %27 in 1 : vector<16x7xbf16>, vector<16x57xbf16> -> vector<16x64xbf16>
    %29 = vector.extract_strided_slice %12 {offsets = [2, 0], sizes = [1, 64], strides = [1, 1]} : vector<9x64xbf16> to vector<1x64xbf16>
    %30 = vector.broadcast %29 : vector<1x64xbf16> to vector<16x64xbf16>
    %31 = arith.mulf %28, %30 : vector<16x64xbf16>
    %32 = vector.extract_strided_slice %11 {offsets = [0, 63], sizes = [16, 1], strides = [1, 1]} : vector<16x64xbf16> to vector<16x1xbf16>
    %33 = vector.extract_strided_slice %11 {offsets = [0, 0], sizes = [16, 63], strides = [1, 1]} : vector<16x64xbf16> to vector<16x63xbf16>
    %34 = tpu.concatenate %32, %33 in 1 : vector<16x1xbf16>, vector<16x63xbf16> -> vector<16x64xbf16>
    %35 = vector.extract_strided_slice %12 {offsets = [3, 0], sizes = [1, 64], strides = [1, 1]} : vector<9x64xbf16> to vector<1x64xbf16>
    %36 = vector.broadcast %35 : vector<1x64xbf16> to vector<16x64xbf16>
    %37 = arith.mulf %34, %36 : vector<16x64xbf16>
    %38 = vector.extract_strided_slice %12 {offsets = [4, 0], sizes = [1, 64], strides = [1, 1]} : vector<9x64xbf16> to vector<1x64xbf16>
    %39 = vector.broadcast %38 : vector<1x64xbf16> to vector<16x64xbf16>
    %40 = arith.mulf %11, %39 : vector<16x64xbf16>
    %41 = vector.extract_strided_slice %11 {offsets = [0, 1], sizes = [16, 63], strides = [1, 1]} : vector<16x64xbf16> to vector<16x63xbf16>
    %42 = vector.extract_strided_slice %11 {offsets = [0, 0], sizes = [16, 1], strides = [1, 1]} : vector<16x64xbf16> to vector<16x1xbf16>
    %43 = tpu.concatenate %41, %42 in 1 : vector<16x63xbf16>, vector<16x1xbf16> -> vector<16x64xbf16>
    %44 = vector.extract_strided_slice %12 {offsets = [5, 0], sizes = [1, 64], strides = [1, 1]} : vector<9x64xbf16> to vector<1x64xbf16>
    %45 = vector.broadcast %44 : vector<1x64xbf16> to vector<16x64xbf16>
    %46 = arith.mulf %43, %45 : vector<16x64xbf16>
    %47 = vector.extract_strided_slice %11 {offsets = [0, 7], sizes = [16, 57], strides = [1, 1]} : vector<16x64xbf16> to vector<16x57xbf16>
    %48 = vector.extract_strided_slice %11 {offsets = [0, 0], sizes = [16, 7], strides = [1, 1]} : vector<16x64xbf16> to vector<16x7xbf16>
    %49 = tpu.concatenate %47, %48 in 1 : vector<16x57xbf16>, vector<16x7xbf16> -> vector<16x64xbf16>
    %50 = vector.extract_strided_slice %12 {offsets = [6, 0], sizes = [1, 64], strides = [1, 1]} : vector<9x64xbf16> to vector<1x64xbf16>
    %51 = vector.broadcast %50 : vector<1x64xbf16> to vector<16x64xbf16>
    %52 = arith.mulf %49, %51 : vector<16x64xbf16>
    %53 = vector.extract_strided_slice %11 {offsets = [0, 8], sizes = [16, 56], strides = [1, 1]} : vector<16x64xbf16> to vector<16x56xbf16>
    %54 = vector.extract_strided_slice %11 {offsets = [0, 0], sizes = [16, 8], strides = [1, 1]} : vector<16x64xbf16> to vector<16x8xbf16>
    %55 = tpu.concatenate %53, %54 in 1 : vector<16x56xbf16>, vector<16x8xbf16> -> vector<16x64xbf16>
    %56 = vector.extract_strided_slice %12 {offsets = [7, 0], sizes = [1, 64], strides = [1, 1]} : vector<9x64xbf16> to vector<1x64xbf16>
    %57 = vector.broadcast %56 : vector<1x64xbf16> to vector<16x64xbf16>
    %58 = arith.mulf %55, %57 : vector<16x64xbf16>
    %59 = vector.extract_strided_slice %11 {offsets = [0, 9], sizes = [16, 55], strides = [1, 1]} : vector<16x64xbf16> to vector<16x55xbf16>
    %60 = vector.extract_strided_slice %11 {offsets = [0, 0], sizes = [16, 9], strides = [1, 1]} : vector<16x64xbf16> to vector<16x9xbf16>
    %61 = tpu.concatenate %59, %60 in 1 : vector<16x55xbf16>, vector<16x9xbf16> -> vector<16x64xbf16>
    %62 = vector.extract_strided_slice %12 {offsets = [8, 0], sizes = [1, 64], strides = [1, 1]} : vector<9x64xbf16> to vector<1x64xbf16>
    %63 = vector.broadcast %62 : vector<1x64xbf16> to vector<16x64xbf16>
    %64 = arith.mulf %61, %63 : vector<16x64xbf16>
    %65 = tpu.concatenate %19, %25, %31, %37, %40, %46, %52, %58, %64 in 0 : vector<16x64xbf16>, vector<16x64xbf16>, vector<16x64xbf16>, vector<16x64xbf16>, vector<16x64xbf16>, vector<16x64xbf16>, vector<16x64xbf16>, vector<16x64xbf16>, vector<16x64xbf16> -> vector<144x64xbf16>
    %cst_10 = arith.constant dense<0.000000e+00> : vector<16x64xf32>
    %66 = tpu.matmul %13, %65, %cst_10 {dimension_numbers = #tpu.dot_dimension_numbers<[1], [0], [0], [1], [0, 0, 1, 1], [], []>} : vector<16x144xbf16>, vector<144x64xbf16>, vector<16x64xf32> -> vector<16x64xf32>
    %67 = arith.truncf %66 : vector<16x64xf32> to vector<16x64xbf16>
    %c0_11 = arith.constant 0 : index
    %c0_12 = arith.constant 0 : index
    %c0_13 = arith.constant 0 : index
    %68 = vector.load %arg6[%c0_11, %c0_12, %c0_13] : memref<1x16x64xbf16, #tpu.memory_space<vmem>>, vector<1x16x64xbf16>
    %69 = vector.shape_cast %68 : vector<1x16x64xbf16> to vector<16x64xbf16>
    %70 = vector.shape_cast %67 : vector<16x64xbf16> to vector<1x16x64xbf16>
    tpu.vector_store %arg6[%c0_11, %c0_12, %c0_13], %70 {strides = array<i32>} : memref<1x16x64xbf16, #tpu.memory_space<vmem>>, vector<1x16x64xbf16>,
    %71 = vector.extract_strided_slice %67 {offsets = [0, 0], sizes = [8, 64], strides = [1, 1]} : vector<16x64xbf16> to vector<8x64xbf16>
    %72 = arith.extf %71 : vector<8x64xbf16> to vector<8x64xf32>
    %cst_14 = arith.constant dense<0.000000e+00> : vector<8xf32>
    %73 = vector.multi_reduction <add>, %72, %cst_14 [1] : vector<8x64xf32> to vector<8xf32>
    %74 = vector.shape_cast %73 : vector<8xf32> to vector<8x1xf32>
    %75 = arith.mulf %72, %72 : vector<8x64xf32>
    %cst_15 = arith.constant dense<0.000000e+00> : vector<8xf32>
    %76 = vector.multi_reduction <add>, %75, %cst_15 [1] : vector<8x64xf32> to vector<8xf32>
    %77 = vector.shape_cast %76 : vector<8xf32> to vector<8x1xf32>
    %78 = tpu.concatenate %74, %77 in 1 : vector<8x1xf32>, vector<8x1xf32> -> vector<8x2xf32>
    %c0_16 = arith.constant 0 : index
    %c0_17 = arith.constant 0 : index
    %c0_18 = arith.constant 0 : index
    %79 = vector.load %arg7[%c0_16, %c0_17, %c0_18] : memref<1x8x2xf32, #tpu.memory_space<vmem>>, vector<1x8x2xf32>
    %80 = vector.shape_cast %79 : vector<1x8x2xf32> to vector<8x2xf32>
    %81 = vector.shape_cast %78 : vector<8x2xf32> to vector<1x8x2xf32>
    tpu.vector_store %arg7[%c0_16, %c0_17, %c0_18], %81 {strides = array<i32>} : memref<1x8x2xf32, #tpu.memory_space<vmem>>, vector<1x8x2xf32>,
    return
  }
  func.func @transform_0(%arg0: i32) -> (i32, i32, i32) {
    %c0_i32 = arith.constant 0 : i32
    %c0_i32_0 = arith.constant 0 : i32
    %c0_i32_1 = arith.constant 0 : i32
    return %arg0, %c0_i32, %c0_i32_0 : i32, i32, i32
  }
  func.func @transform_1(%arg0: i32) -> (i32, i32) {
    %c0_i32 = arith.constant 0 : i32
    %c0_i32_0 = arith.constant 0 : i32
    %c0_i32_1 = arith.constant 0 : i32
    return %c0_i32, %c0_i32_0 : i32, i32
  }
  func.func @transform_2(%arg0: i32) -> (i32, i32) {
    %c0_i32 = arith.constant 0 : i32
    %c0_i32_0 = arith.constant 0 : i32
    %c0_i32_1 = arith.constant 0 : i32
    return %c0_i32, %c0_i32_0 : i32, i32
  }
  func.func @transform_3(%arg0: i32) -> (i32, i32) {
    %c0_i32 = arith.constant 0 : i32
    %c0_i32_0 = arith.constant 0 : i32
    %c0_i32_1 = arith.constant 0 : i32
    return %c0_i32, %c0_i32_0 : i32, i32
  }
  func.func @transform_4(%arg0: i32) -> (i32, i32) {
    %c0_i32 = arith.constant 0 : i32
    %c0_i32_0 = arith.constant 0 : i32
    %c0_i32_1 = arith.constant 0 : i32
    return %c0_i32, %c0_i32_0 : i32, i32
  }
  func.func @transform_5(%arg0: i32) -> (i32, i32, i32) {
    %c0_i32 = arith.constant 0 : i32
    %c0_i32_0 = arith.constant 0 : i32
    %c0_i32_1 = arith.constant 0 : i32
    return %arg0, %c0_i32, %c0_i32_0 : i32, i32, i32
  }
  func.func @transform_6(%arg0: i32) -> (i32, i32, i32) {
    %c0_i32 = arith.constant 0 : i32
    %c0_i32_0 = arith.constant 0 : i32
    %c0_i32_1 = arith.constant 0 : i32
    return %arg0, %c0_i32, %c0_i32_0 : i32, i32, i32
  }
}

module attributes {stable_mosaic.version = 11 : i64} {
  func.func @_bn_relu_kernel(%arg0: i32, %arg1: memref<1x16x64xbf16, #tpu.memory_space<vmem>>, %arg2: memref<8x1xf32, #tpu.memory_space<vmem>>, %arg3: memref<8x1xf32, #tpu.memory_space<vmem>>, %arg4: memref<1x8x64xf32, #tpu.memory_space<vmem>>) attributes {dimension_semantics = [#tpu.dimension_semantics<parallel>], iteration_bounds = array<i64: 2>, scalar_prefetch = 0 : i64, scratch_operands = 0 : i64, tpu.core_type = #tpu.core_type<tc>, window_params = [{transform_indices = @transform_0, window_bounds = array<i64: 1, 16, 64>}, {pipeline_mode = #tpu.pipeline_mode<synchronous>, transform_indices = @transform_1, window_bounds = array<i64: 8, 1>}, {pipeline_mode = #tpu.pipeline_mode<synchronous>, transform_indices = @transform_2, window_bounds = array<i64: 8, 1>}, {transform_indices = @transform_3, window_bounds = array<i64: 1, 8, 64>}]} {
    %c0 = arith.constant 0 : index
    %c0_0 = arith.constant 0 : index
    %c0_1 = arith.constant 0 : index
    %0 = vector.load %arg1[%c0, %c0_0, %c0_1] : memref<1x16x64xbf16, #tpu.memory_space<vmem>>, vector<1x16x64xbf16>
    %1 = vector.shape_cast %0 : vector<1x16x64xbf16> to vector<16x64xbf16>
    %2 = vector.extract_strided_slice %1 {offsets = [0, 0], sizes = [8, 64], strides = [1, 1]} : vector<16x64xbf16> to vector<8x64xbf16>
    %3 = arith.extf %2 : vector<8x64xbf16> to vector<8x64xf32>
    %c0_2 = arith.constant 0 : index
    %c0_3 = arith.constant 0 : index
    %4 = vector.load %arg2[%c0_2, %c0_3] : memref<8x1xf32, #tpu.memory_space<vmem>>, vector<8x1xf32>
    %5 = vector.broadcast %4 : vector<8x1xf32> to vector<8x64xf32>
    %6 = arith.mulf %3, %5 : vector<8x64xf32>
    %c0_4 = arith.constant 0 : index
    %c0_5 = arith.constant 0 : index
    %7 = vector.load %arg3[%c0_4, %c0_5] : memref<8x1xf32, #tpu.memory_space<vmem>>, vector<8x1xf32>
    %8 = vector.broadcast %7 : vector<8x1xf32> to vector<8x64xf32>
    %9 = arith.addf %6, %8 : vector<8x64xf32>
    %cst = arith.constant 0.000000e+00 : f32
    %10 = vector.broadcast %cst : f32 to vector<8x64xf32>
    %11 = arith.maximumf %9, %10 : vector<8x64xf32>
    %c0_6 = arith.constant 0 : index
    %c0_7 = arith.constant 0 : index
    %c0_8 = arith.constant 0 : index
    %12 = vector.load %arg4[%c0_6, %c0_7, %c0_8] : memref<1x8x64xf32, #tpu.memory_space<vmem>>, vector<1x8x64xf32>
    %13 = vector.shape_cast %12 : vector<1x8x64xf32> to vector<8x64xf32>
    %14 = vector.shape_cast %11 : vector<8x64xf32> to vector<1x8x64xf32>
    tpu.vector_store %arg4[%c0_6, %c0_7, %c0_8], %14 {strides = array<i32>} : memref<1x8x64xf32, #tpu.memory_space<vmem>>, vector<1x8x64xf32>,
    return
  }
  func.func @transform_0(%arg0: i32) -> (i32, i32, i32) {
    %c0_i32 = arith.constant 0 : i32
    %c0_i32_0 = arith.constant 0 : i32
    %c0_i32_1 = arith.constant 0 : i32
    return %arg0, %c0_i32, %c0_i32_0 : i32, i32, i32
  }
  func.func @transform_1(%arg0: i32) -> (i32, i32) {
    %c0_i32 = arith.constant 0 : i32
    %c0_i32_0 = arith.constant 0 : i32
    %c0_i32_1 = arith.constant 0 : i32
    return %c0_i32, %c0_i32_0 : i32, i32
  }
  func.func @transform_2(%arg0: i32) -> (i32, i32) {
    %c0_i32 = arith.constant 0 : i32
    %c0_i32_0 = arith.constant 0 : i32
    %c0_i32_1 = arith.constant 0 : i32
    return %c0_i32, %c0_i32_0 : i32, i32
  }
  func.func @transform_3(%arg0: i32) -> (i32, i32, i32) {
    %c0_i32 = arith.constant 0 : i32
    %c0_i32_0 = arith.constant 0 : i32
    %c0_i32_1 = arith.constant 0 : i32
    return %arg0, %c0_i32, %c0_i32_0 : i32, i32, i32
  }
}

</mosaic_0001>

<bundles_post_ra>
// kernel: down_forward.3
= control target key start
LH: loop header
LB: loop body
LE: loop exit
PB: predicated region body
PF: predicated region fallthrough
CT: control target
= control target key end

     0   :  { %s624_s15 = smov 0   ;;  %s696_s0 = inlined_call_operand.vmem [shape: bf16[2,16,64], index: 0, kind: input, shape index: {}]   ;;  %s697_s1 = inlined_call_operand.vmem [shape: bf16[9,64], index: 1, kind: input, shape index: {}]   ;;  %s698_s2 = inlined_call_operand.vmem [shape: bf16[16,144], index: 2, kind: input, shape index: {}]   ;;  %s699_s3 = inlined_call_operand.vmem [shape: bf16[2,16,64], index: 3, kind: output, shape index: {0}]   ;;  %s700_s4 = inlined_call_operand.vmem [shape: f32[2,8,2], index: 4, kind: output, shape index: {1}]  }
   0x1 LB: > { %s521_s16 = sadd.s32 4294967295, %s580_s15   ;;  %p525_p0 = scmp.ge.s32.totalorder %s580_s15, 1  ;;  %s580_s15 = sphi %s624_s15, %s15_s15  }
   0x2   : > { %p165_p1 = scmp.lt.s32.totalorder %s580_s15, 3 }
   0x4   : > { %p166_p2 = pnand %p525_p0, %p165_p1 }
   0x5   : > { %p195_p3 = scmp.lt.s32.totalorder (!%p166_p2), %s521_s16, 1  ;;  %v582_v0 = vmov (!%p166_p2), 0   ;;  %v233_v1 = vlaneseq (!%p166_p2)  ;;  %v212_v6 = vld [vmem:[%s697_s1] sm:$0xf] (!%p166_p2)  ;;  %s583_s23 = smov (!%p166_p2), 72   ;;  %vm367_vm0 = vcmask (!%p166_p2), 130048  }
   0x6   : > { %169 = sbr.rel (%p166_p2) target bundleno = 541 (0x21d), region = 32  ;;  %371 = vmatprep.subr.bf16.mxu0 (!%p166_p2), %v582_v0  ;;  %s584_s24 = smov (!%p166_p2), 73   ;;  %v644_v7 = vpack.i.b16 (!%p166_p2), %v212_v6, %v212_v6  ;;  %v573_v14 = vld [vmem:[%s698_s2 + $0x4] ss:$8 sps:$4 sm:$0xff] (!%p166_p2)   ;;  %v247_v16 = vshrl.u32 (!%p166_p2), %v212_v6, 16  ;;  %vm225_vm1 = vcmask (!%p166_p2), 72704  }
   0x7   : > { %v639_v5 = vshrl.u32 (!%p166_p2), %v233_v1, 7  ;;  %s585_s25 = smov (!%p166_p2), 8   ;;  %s586_s26 = smov (!%p166_p2), 9   ;;  %536 = vmatprep.mubr.msk.bf16.mxu0 (!%p166_p2), %vm367_vm0, %v573_v14  ;;  %vm242_vm2 = vcmask (!%p166_p2), 64512   ;;  %vm259_vm3 = vcmask (!%p166_p2), 56320   ;;  %vm273_vm4 = vcmask (!%p166_p2), 7168  }
   0x8   : > { %s587_s27 = smov (!%p166_p2), 7   ;;  %s588_s28 = smov (!%p166_p2), 71   ;;  %v248_v19 = vpack.i.b16 (!%p166_p2), %v247_v16, %v247_v16  ;;  %vm297_vm5 = vcmask (!%p166_p2), 515072   ;;  %vm311_vm6 = vcmask (!%p166_p2), 465920   ;;  %v213_v51 = vld [vmem:[%s697_s1 + $0x4] sm:$0x1] (!%p166_p2) }
   0x9   : > { %v285_v8 = vsub.s32 (!%p166_p2), 2, %v639_v5  ;;  %s589_s29 = smov (!%p166_p2), 1   ;;  %s590_s30 = smov (!%p166_p2), 65   ;;  %v656_v15 = vsub.s32 (!%p166_p2), 0, %v639_v5  ;;  %v266_v23 = vsub.s32 (!%p166_p2), 1, %v639_v5  ;;  %v318_v43 = vsub.s32 (!%p166_p2), 3, %v639_v5 }
   0xa   : > { %s591_s5 = smov (!%p166_p2), 63   ;;  %s592_s6 = smov (!%p166_p2), 127   ;;  %vm325_vm7 = vcmask (!%p166_p2), 457728   ;;  %v345_v54 = vpack.i.b16 (!%p166_p2), %v213_v51, %v213_v51  ;;  %vm339_vm8 = vcmask (!%p166_p2), 449536   ;;  %v571_v62 = vld [vmem:[%s698_s2] ss:$8 sps:$4 sm:$0xff] (!%p166_p2)  }
   0xb   : > { %v286_v9 = vrot.slane (!%p166_p2), %v644_v7, %v285_v8  ;;  %s593_s7 = smov (!%p166_p2), 57   ;;  %s594_s8 = smov (!%p166_p2), 121   ;;  %v236_v20 = vrot.slane (!%p166_p2), %v644_v7, %v656_v15  ;;  %v253_v25 = vrot.slane (!%p166_p2), %v248_v19, %v656_v15  ;;  %v267_v29 = vrot.slane (!%p166_p2), %v644_v7, %v266_v23 }
   0xc   : > { %s595_s9 = smov (!%p166_p2), 56   ;;  %s596_s10 = smov (!%p166_p2), 120   ;;  %v281_v35 = vrot.slane (!%p166_p2), %v248_v19, %v266_v23  ;;  %v305_v41 = vrot.slane (!%p166_p2), %v248_v19, %v285_v8  ;;  %v319_v47 = vrot.slane (!%p166_p2), %v644_v7, %v318_v43  ;;  %v333_v53 = vrot.slane (!%p166_p2), %v248_v19, %v318_v43 }
   0xd   : > { %s702_s16 = smov (!%p195_p3, %s521_s16), 1  ;;  %v532_v10 = vcombine.low %v286_v9, %v286_v9  ;;  %s597_s13 = smov 55   ;;  %v350_v59 = vrot.slane %v345_v54, %v656_v15  ;;  %vm420_vm9 = vcmask 519168   ;;  %vm424_vm10 = vcmask 523264  }
   0xe   : > { %s633_s17 = sshll.u32 %s702_s16, 3  ;;  %s598_s14 = smov 119   ;;  %vm433_vm11 = vcmask 15360  }
   0xf   : > { %s199_s20 = scalar_lea.vmem %s696_s0, %s633_s17 }
  0x10   : > { %v210_v2 = vld [vmem:[%s199_s20] sm:$0xf]  ;;  %v211_v3 = vld [vmem:[%s199_s20 + $0x4] sm:$0xf] }
  0x11   : > { %v531_v4 = vcombine.low %v210_v2, %v211_v3  ;;  %v291_v11 = vmul.bf16 %v532_v10, %v210_v2  ;;  %v292_v12 = vmul.bf16 %v532_v10, %v211_v3 }
  0x13   : > { %238 = vrot.lane.b32.xlu1 %v531_v4, %s583_s23  ;;  %221 = vrot.lane.b32.xlu0 %v531_v4, %s584_s24  ;;  %v650_v13 = vcombine.low %v291_v11, %v292_v12  ;;  %s204_s23 = scalar_lea.vmem %s699_s3, %s633_s17 }
  0x17   : > { %240 = vrot.lane.b32.xlu1 %v531_v4, %s585_s25  ;;  %223 = vrot.lane.b32.xlu0 %v531_v4, %s586_s26  ;;  %s208_s26 = scalar_lea.vmem %s700_s4, %s633_s17 }
  0x1b   : > { %257 = vrot.lane.b32.xlu1 %v531_v4, %s587_s27  ;;  %255 = vrot.lane.b32.xlu0 %v531_v4, %s588_s28 }
  0x1f   : > { %271 = vrot.lane.b32.xlu1 %v531_v4, %s589_s29  ;;  %269 = vrot.lane.b32.xlu0 %v531_v4, %s590_s30 }
  0x23   : > { %295 = vrot.lane.b32.xlu1 %v531_v4, %s591_s5  ;;  %293 = vrot.lane.b32.xlu0 %v531_v4, %s592_s6 }
  0x27   : > { %309 = vrot.lane.b32.xlu1 %v531_v4, %s593_s7  ;;  %307 = vrot.lane.b32.xlu0 %v531_v4, %s594_s8 }
  0x2b   : > { %323 = vrot.lane.b32.xlu1 %v531_v4, %s595_s9  ;;  %321 = vrot.lane.b32.xlu0 %v531_v4, %s596_s10 }
  0x2f   : > { %337 = vrot.lane.b32.xlu1 %v531_v4, %s597_s13  ;;  %335 = vrot.lane.b32.xlu0 %v531_v4, %s598_s14 }
  0x85   : > { %v239_v17 = vpop.permute.xlu1 %238  ;;  %v222_v18 = vpop.permute.xlu0 %221 }
  0x89   : > { %v241_v21 = vpop.permute.xlu1 %240  ;;  %v224_v22 = vpop.permute.xlu0 %223 }
  0x8a   : > { %v228_v24 = vsel %vm225_vm1, %v222_v18, %v224_v22  ;;  %v245_v27 = vsel %vm242_vm2, %v239_v17, %v241_v21 }
  0x8b   : > { %v237_v26 = vmul.bf16 %v236_v20, %v228_v24  ;;  %v254_v32 = vmul.bf16 %v253_v25, %v245_v27 }
  0x8d   : > { %372 = vmatpush1.bf16.msra.mxu0 %v237_v26  ;;  %v258_v28 = vpop.permute.xlu1 %257  ;;  %v256_v30 = vpop.permute.xlu0 %255 }
  0x8e   : > { %373 = vmatprep.subr.bf16.mxu0 %v582_v0  ;;  %v262_v31 = vsel %vm259_vm3, %v256_v30, %v258_v28 }
  0x8f   : > { %v268_v33 = vmul.bf16 %v267_v29, %v262_v31 }
  0x91   : > { %374 = vmatpush1.bf16.msra.mxu0 %v254_v32  ;;  %v272_v34 = vpop.permute.xlu1 %271  ;;  %v270_v36 = vpop.permute.xlu0 %269 }
  0x92   : > { %375 = vmatprep.subr.bf16.mxu0 %v582_v0  ;;  %v276_v37 = vsel %vm273_vm4, %v270_v36, %v272_v34 }
  0x93   : > { %v282_v38 = vmul.bf16 %v281_v35, %v276_v37 }
  0x95   : > { %376 = vmatpush1.bf16.msra.mxu0 %v268_v33  ;;  %v296_v39 = vpop.permute.xlu1 %295  ;;  %v294_v40 = vpop.permute.xlu0 %293 }
  0x96   : > { %377 = vmatprep.subr.bf16.mxu0 %v582_v0  ;;  %v300_v45 = vsel %vm297_vm5, %v294_v40, %v296_v39 }
  0x97   : > { %v306_v46 = vmul.bf16 %v305_v41, %v300_v45 }
  0x99   : > { %378 = vmatpush1.bf16.msra.mxu0 %v282_v38  ;;  %v310_v42 = vpop.permute.xlu1 %309  ;;  %v308_v44 = vpop.permute.xlu0 %307 }
  0x9a   : > { %379 = vmatprep.subr.bf16.mxu0 %v582_v0  ;;  %v314_v50 = vsel %vm311_vm6, %v308_v44, %v310_v42 }
  0x9b   : > { %v320_v52 = vmul.bf16 %v319_v47, %v314_v50 }
  0x9d   : > { %380 = vmatpush1.bf16.msra.mxu0 %v650_v13  ;;  %v324_v48 = vpop.permute.xlu1 %323  ;;  %v322_v49 = vpop.permute.xlu0 %321 }
  0x9e   : > { %381 = vmatprep.subr.bf16.mxu0 %v582_v0  ;;  %v328_v55 = vsel %vm325_vm7, %v322_v49, %v324_v48 }
  0x9f   : > { %v334_v58 = vmul.bf16 %v333_v53, %v328_v55 }
  0xa1   : > { %382 = vmatpush1.bf16.msra.mxu0 %v306_v46  ;;  %v338_v56 = vpop.permute.xlu1 %337  ;;  %v336_v57 = vpop.permute.xlu0 %335 }
  0xa2   : > { %383 = vmatprep.subr.bf16.mxu0 %v582_v0  ;;  %v342_v60 = vsel %vm339_vm8, %v336_v57, %v338_v56 }
  0xa3   : > { %v351_v61 = vmul.bf16 %v350_v59, %v342_v60 }
  0xa5   : > { %384 = vmatpush1.bf16.msra.mxu0 %v320_v52 }
  0xa6   : > { %385 = vmatprep.subr.bf16.mxu0 %v582_v0 }
  0xa9   : > { %386 = vmatpush1.bf16.msra.mxu0 %v334_v58 }
  0xaa   : > { %387 = vmatprep.subr.bf16.mxu0 %v582_v0 }
  0xad   : > { %388 = vmatpush1.bf16.msra.mxu0 %v351_v61 }
  0xb0   : > { %404 = vmatmul.mubr.bf16.vlgmr.msra.gmra.mrb[0].mxu0 %v571_v62 }
 0x183   : > { %v405_v63 = vpop.f32.mrb[0].mxu0 }
 0x184   : > { %v543_v1 = vpack.c.bf16 %v405_v63, %v405_v63  ;;  %v407_v2 = vpop.f32.mrb[1].mxu0 }
 0x185   : > { %v408_v3 = vpop.f32.mrb[2].mxu0 }
 0x186   : > { %421 = vst.msk [vmem:[%s204_s23] sm:$0xf] %vm420_vm9, %v543_v1  ;;  %v412_v4 = vpack.c.bf16 %v408_v3, %v405_v63  ;;  %v544_v5 = vpack.c.bf16 %v408_v3, %v408_v3  ;;  %v410_v0 = vpop.f32.mrb[3].mxu0 }
 0x188   : > { %422 = vst.msk [vmem:[%s204_s23 + $0x4] sm:$0xf] %vm420_vm9, %v544_v5  ;;  %v423_v6 = vunpack.c.l.bf16 %v412_v4 }
 0x18a   : > { %v425_v7 = vsel %vm424_vm10, %v423_v6, 0.0  ;;  %v428_v8 = vmul.f32 %v423_v6, %v423_v6 }
 0x18b   : > { %426 = vadd.xlane.f32.xlu0 %v425_v7 }
 0x18c   : > { %v429_v9 = vsel %vm424_vm10, %v428_v8, 0.0 }
 0x18d   : > { %430 = vadd.xlane.f32.xlu1 %v429_v9 }
 0x218   : > { %v427_v10 = vpop.xlane.xlu0 %426 }
 0x21a   : > { %v431_v11 = vpop.xlane.xlu1 %430 }
 0x21b   : > { %v432_v12 = vsel %vm273_vm4, %v427_v10, %v431_v11 }
 0x21c   : > { %434 = vst.msk [vmem:[%s208_s26] sm:$0xff] %vm433_vm11, %v432_v12 }
 0x21d PF: > { %s15_s15 = sadd.s32 1, %s580_s15  }
 0x21e   : > { %p12_p4 = scmp.ge.s32.totalorder %s15_s15, 4  }
 0x220   :  { %14 = sbr.rel (!%p12_p4) target bundleno = 1 (0x1), region = 74 }

// kernel: down_forward.5
= control target key start
LH: loop header
LB: loop body
LE: loop exit
PB: predicated region body
PF: predicated region fallthrough
CT: control target
= control target key end

     0   :  { %s291_s12 = smov 0   ;;  %s314_s0 = inlined_call_operand.vmem [shape: bf16[2,16,64], index: 0, kind: input, shape index: {}]   ;;  %s315_s1 = inlined_call_operand.vmem [shape: f32[8,1], index: 1, kind: input, shape index: {}]   ;;  %s316_s2 = inlined_call_operand.vmem [shape: f32[8,1], index: 2, kind: input, shape index: {}]   ;;  %s317_s3 = inlined_call_operand.vmem [shape: f32[2,8,64], index: 3, kind: output, shape index: {}]  }
   0x1 LB: > { %s241_s13 = sadd.s32 4294967295, %s268_s12   ;;  %p245_p0 = scmp.ge.s32.totalorder %s268_s12, 1  ;;  %s268_s12 = sphi %s291_s12, %s13_s12  }
   0x2   : > { %p137_p1 = scmp.lt.s32.totalorder %s268_s12, 3 }
   0x4   : > { %p138_p2 = pnand %p245_p0, %p137_p1 }
   0x5   : > { %v171_v0 = vld [vmem:[%s315_s1] sm:$0xff] (!%p138_p2)  ;;  %v270_v1 = vmov (!%p138_p2), 0   ;;  %p160_p3 = scmp.lt.s32.totalorder (!%p138_p2), %s241_s13, 1  ;;  %vm186_vm0 = vcmask (!%p138_p2), 523264  }
   0x6   : > { %141 = sbr.rel (%p138_p2) target bundleno = 144 (0x90), region = 32  ;;  %261 = vset.pattern.permute.xlu0 (!%p138_p2), %v270_v1  ;;  %v178_v2 = vld [vmem:[%s316_s2] sm:$0xff] (!%p138_p2) }
   0x7   : > { %174 = vperm.xlu0 (!%p138_p2), %261, %v171_v0  }
   0xb   : > { %181 = vperm.xlu0 (!%p138_p2), %261, %v178_v2  }
   0xd   : > { %s319_s13 = smov (!%p160_p3, %s241_s13), 1 }
   0xe   : > { %s251_s18 = sshll.u32 %s319_s13, 3 }
   0xf   : > { %s164_s21 = scalar_lea.vmem %s314_s0, %s251_s18  ;;  %s168_s24 = scalar_lea.vmem %s317_s3, %s251_s18 }
  0x10   : > { %v169_v3 = vld [vmem:[%s164_s21] sm:$0xf] }
  0x11   : > { %v170_v4 = vunpack.c.l.bf16 %v169_v3 }
  0x86   : > { %v175_v5 = vpop.permute.xlu0 %174 }
  0x87   : > { %v177_v6 = vmul.f32 %v175_v5, %v170_v4 }
  0x8a   : > { %v182_v7 = vpop.permute.xlu0 %181 }
  0x8b   : > { %v184_v8 = vadd.f32 %v182_v7, %v177_v6 }
  0x8d   : > { %v185_v9 = vmax.f32 %v184_v8, 0.0 }
  0x8f   : > { %187 = vst.msk [vmem:[%s168_s24] sm:$0xff] %vm186_vm0, %v185_v9 }
  0x90 PF: > { %s13_s12 = sadd.s32 1, %s268_s12  }
  0x91   : > { %p10_p4 = scmp.ge.s32.totalorder %s13_s12, 4  }
  0x93   :  { %12 = sbr.rel (!%p10_p4) target bundleno = 1 (0x1), region = 62 }

// kernel: down_forward.4
= control target key start
LH: loop header
LB: loop body
LE: loop exit
PB: predicated region body
PF: predicated region fallthrough
CT: control target
= control target key end

     0   :  { %s708_s21 = smov 0   ;;  %s800_s0 = inlined_call_operand.vmem [shape: bf16[2,16,64], index: 0, kind: input, shape index: {}]   ;;  %s801_s1 = inlined_call_operand.vmem [shape: f32[16,1], index: 1, kind: input, shape index: {}]   ;;  %s802_s2 = inlined_call_operand.vmem [shape: f32[16,1], index: 2, kind: input, shape index: {}]   ;;  %s803_s3 = inlined_call_operand.vmem [shape: bf16[9,64], index: 3, kind: input, shape index: {}]   ;;  %s804_s4 = inlined_call_operand.vmem [shape: bf16[16,144], index: 4, kind: input, shape index: {}]   ;;  %s805_s5 = inlined_call_operand.vmem [shape: bf16[2,16,64], index: 5, kind: output, shape index: {0}]   ;;  %s806_s6 = inlined_call_operand.vmem [shape: f32[2,8,2], index: 6, kind: output, shape index: {1}]  }
   0x1 LB: > { %s593_s22 = sadd.s32 4294967295, %s654_s21   ;;  %p597_p0 = scmp.ge.s32.totalorder %s654_s21, 1  ;;  %s654_s21 = sphi %s708_s21, %s17_s21  }
   0x2   : > { %p215_p1 = scmp.lt.s32.totalorder %s654_s21, 3 }
   0x4   : > { %p216_p2 = pnand %p597_p0, %p215_p1 }
   0x5   : > { %v282_v0 = vld [vmem:[%s802_s2] sm:$0xff] (!%p216_p2)  ;;  %v656_v2 = vmov (!%p216_p2), 0   ;;  %v283_v3 = vld [vmem:[%s802_s2 + $0x8] sm:$0xff] (!%p216_p2)  ;;  %p249_p3 = scmp.lt.s32.totalorder (!%p216_p2), %s593_s22, 1  ;;  %s657_s11 = smov (!%p216_p2), 9   ;;  %vm439_vm0 = vcmask (!%p216_p2), 130048   ;;  %v316_v20 = vlaneseq (!%p216_p2) }
   0x6   : > { %219 = sbr.rel (%p216_p2) target bundleno = 665 (0x299), region = 40  ;;  %v268_v1 = vld [vmem:[%s801_s1] sm:$0xff] (!%p216_p2)  ;;  %644 = vset.pattern.permute.xlu1 (!%p216_p2), %v656_v2  ;;  %643 = vset.pattern.permute.xlu0 (!%p216_p2), %v656_v2  ;;  %v269_v4 = vld [vmem:[%s801_s1 + $0x8] sm:$0xff] (!%p216_p2)  ;;  %s658_s12 = smov (!%p216_p2), 73   ;;  %vm308_vm1 = vcmask (!%p216_p2), 72704   ;;  %vm325_vm2 = vcmask (!%p216_p2), 64512  }
   0x7   : > { %286 = vperm.xlu1 (!%p216_p2), %644, %v282_v0   ;;  %272 = vperm.xlu0 (!%p216_p2), %643, %v268_v1   ;;  %s659_s13 = smov (!%p216_p2), 8   ;;  %s660_s14 = smov (!%p216_p2), 72   ;;  %v647_v19 = vld [vmem:[%s804_s4 + $0x4] ss:$8 sps:$4 sm:$0xff] (!%p216_p2)   ;;  %v758_v21 = vshrl.u32 (!%p216_p2), %v316_v20, 7  ;;  %vm342_vm3 = vcmask (!%p216_p2), 56320  }
   0x8   : > { %443 = vmatprep.subr.bf16.mxu0 (!%p216_p2), %v656_v2  ;;  %s661_s15 = smov (!%p216_p2), 7   ;;  %s662_s16 = smov (!%p216_p2), 71   ;;  %605 = vmatprep.mubr.msk.bf16.mxu0 (!%p216_p2), %vm439_vm0, %v647_v19  ;;  %v299_v22 = vld [vmem:[%s803_s3] sm:$0xf] (!%p216_p2)  ;;  %vm356_vm4 = vcmask (!%p216_p2), 7168   ;;  %vm375_vm5 = vcmask (!%p216_p2), 515072  }
   0x9   : > { %s663_s17 = smov (!%p216_p2), 1   ;;  %s664_s18 = smov (!%p216_p2), 65   ;;  %v764_v23 = vsub.s32 (!%p216_p2), 0, %v758_v21  ;;  %v330_v24 = vshrl.u32 (!%p216_p2), %v299_v22, 16  ;;  %v314_v25 = vpack.i.b16 (!%p216_p2), %v299_v22, %v299_v22  ;;  %v349_v33 = vsub.s32 (!%p216_p2), 1, %v758_v21 }
   0xa   : > { %s665_s19 = smov (!%p216_p2), 63   ;;  %s666_s20 = smov (!%p216_p2), 127   ;;  %v368_v44 = vsub.s32 (!%p216_p2), 2, %v758_v21  ;;  %v396_v53 = vsub.s32 (!%p216_p2), 3, %v758_v21  ;;  %vm389_vm6 = vcmask (!%p216_p2), 465920   ;;  %vm403_vm7 = vcmask (!%p216_p2), 457728  }
   0xb   : > { %291 = vperm.xlu1 (!%p216_p2), %644, %v283_v3   ;;  %277 = vperm.xlu0 (!%p216_p2), %643, %v269_v4   ;;  %s668_s23 = smov (!%p216_p2), 121   ;;  %s669_s26 = smov (!%p216_p2), 56   ;;  %v319_v26 = vrot.slane (!%p216_p2), %v314_v25, %v764_v23  ;;  %v331_v27 = vpack.i.b16 (!%p216_p2), %v330_v24, %v330_v24  ;;  %v350_v38 = vrot.slane (!%p216_p2), %v314_v25, %v349_v33  ;;  %v300_v61 = vld [vmem:[%s803_s3 + $0x4] sm:$0x1] (!%p216_p2)  ;;  %vm417_vm8 = vcmask (!%p216_p2), 449536  }
   0xc   : > { %s670_s27 = smov (!%p216_p2), 120   ;;  %s671_s28 = smov (!%p216_p2), 55   ;;  %v369_v49 = vrot.slane (!%p216_p2), %v314_v25, %v368_v44  ;;  %v397_v59 = vrot.slane (!%p216_p2), %v314_v25, %v396_v53  ;;  %v423_v3 = vpack.i.b16 (!%p216_p2), %v300_v61, %v300_v61  ;;  %vm492_vm9 = vcmask (!%p216_p2), 519168  }
   0xd   : > { %s808_s22 = smov (!%p249_p3, %s593_s22), 1  ;;  %s672_s29 = smov 119   ;;  %v336_v32 = vrot.slane %v331_v27, %v764_v23  ;;  %v364_v43 = vrot.slane %v331_v27, %v349_v33  ;;  %v383_v52 = vrot.slane %v331_v27, %v368_v44  ;;  %v411_v1 = vrot.slane %v331_v27, %v396_v53 }
   0xe   : > { %s731_s7 = sshll.u32 %s808_s22, 3  ;;  %s667_s22 = smov 57   ;;  %vm496_vm10 = vcmask 523264   ;;  %vm505_vm11 = vcmask 15360  }
   0xf   : > { %s253_s10 = scalar_lea.vmem %s800_s0, %s731_s7 }
  0x10   : > { %v615_v5 = vld [vmem:[%s253_s10] sm:$0xff]  }
  0x11   : > { %v616_v6 = vunpack.c.l.bf16 %v615_v5  ;;  %v617_v10 = vunpack.c.h.bf16 %v615_v5 }
  0x86   : > { %v287_v7 = vpop.permute.xlu1 %286  ;;  %v273_v8 = vpop.permute.xlu0 %272 }
  0x87   : > { %v280_v9 = vmul.f32 %v616_v6, %v273_v8  ;;  %v428_v8 = vrot.slane %v423_v3, %v764_v23 }
  0x89   : > { %v294_v12 = vadd.f32 %v287_v7, %v280_v9 }
  0x8a   : > { %v278_v11 = vpop.permute.xlu0 %277  ;;  %v292_v14 = vpop.permute.xlu1 %291 }
  0x8b   : > { %v281_v13 = vmul.f32 %v617_v10, %v278_v11  ;;  %v296_v16 = vmax.f32 %v294_v12, 0.0  ;;  %v645_v11 = vld [vmem:[%s804_s4] ss:$8 sps:$4 sm:$0xff]  }
  0x8d   : > { %v295_v15 = vadd.f32 %v292_v14, %v281_v13 }
  0x8f   : > { %v297_v17 = vmax.f32 %v295_v15, 0.0 }
  0x91   : > { %v737_v18 = vpack.c.bf16 %v297_v17, %v296_v16 }
  0x93   : > { %306 = vrot.lane.b32.xlu1 %v737_v18, %s657_s11  ;;  %304 = vrot.lane.b32.xlu0 %v737_v18, %s658_s12  ;;  %v370_v54 = vmul.bf16 %v369_v49, %v737_v18 }
  0x97   : > { %323 = vrot.lane.b32.xlu1 %v737_v18, %s659_s13  ;;  %321 = vrot.lane.b32.xlu0 %v737_v18, %s660_s14 }
  0x9b   : > { %340 = vrot.lane.b32.xlu1 %v737_v18, %s661_s15  ;;  %338 = vrot.lane.b32.xlu0 %v737_v18, %s662_s16  ;;  %s258_s15 = scalar_lea.vmem %s805_s5, %s731_s7 }
  0x9f   : > { %354 = vrot.lane.b32.xlu1 %v737_v18, %s663_s17  ;;  %352 = vrot.lane.b32.xlu0 %v737_v18, %s664_s18  ;;  %s262_s18 = scalar_lea.vmem %s806_s6, %s731_s7 }
  0xa3   : > { %373 = vrot.lane.b32.xlu1 %v737_v18, %s665_s19  ;;  %371 = vrot.lane.b32.xlu0 %v737_v18, %s666_s20 }
  0xa7   : > { %387 = vrot.lane.b32.xlu1 %v737_v18, %s667_s22  ;;  %385 = vrot.lane.b32.xlu0 %v737_v18, %s668_s23 }
  0xab   : > { %401 = vrot.lane.b32.xlu1 %v737_v18, %s669_s26  ;;  %399 = vrot.lane.b32.xlu0 %v737_v18, %s670_s27 }
  0xaf   : > { %415 = vrot.lane.b32.xlu1 %v737_v18, %s671_s28  ;;  %413 = vrot.lane.b32.xlu0 %v737_v18, %s672_s29 }
 0x105   : > { %v307_v28 = vpop.permute.xlu1 %306  ;;  %v305_v29 = vpop.permute.xlu0 %304 }
 0x106   : > { %v311_v30 = vsel %vm308_vm1, %v305_v29, %v307_v28 }
 0x107   : > { %v320_v31 = vmul.bf16 %v319_v26, %v311_v30 }
 0x109   : > { %v324_v34 = vpop.permute.xlu1 %323  ;;  %444 = vmatpush1.bf16.msra.mxu0 %v320_v31  ;;  %v322_v35 = vpop.permute.xlu0 %321 }
 0x10a   : > { %v328_v36 = vsel %vm325_vm2, %v322_v35, %v324_v34  ;;  %445 = vmatprep.subr.bf16.mxu0 %v656_v2 }
 0x10b   : > { %v337_v37 = vmul.bf16 %v336_v32, %v328_v36 }
 0x10d   : > { %v341_v39 = vpop.permute.xlu1 %340  ;;  %446 = vmatpush1.bf16.msra.mxu0 %v337_v37  ;;  %v339_v40 = vpop.permute.xlu0 %338 }
 0x10e   : > { %v345_v41 = vsel %vm342_vm3, %v339_v40, %v341_v39  ;;  %447 = vmatprep.subr.bf16.mxu0 %v656_v2 }
 0x10f   : > { %v351_v42 = vmul.bf16 %v350_v38, %v345_v41 }
 0x111   : > { %v355_v45 = vpop.permute.xlu1 %354  ;;  %448 = vmatpush1.bf16.msra.mxu0 %v351_v42  ;;  %v353_v46 = vpop.permute.xlu0 %352 }
 0x112   : > { %v359_v47 = vsel %vm356_vm4, %v353_v46, %v355_v45  ;;  %449 = vmatprep.subr.bf16.mxu0 %v656_v2 }
 0x113   : > { %v365_v48 = vmul.bf16 %v364_v43, %v359_v47 }
 0x115   : > { %v374_v50 = vpop.permute.xlu1 %373  ;;  %450 = vmatpush1.bf16.msra.mxu0 %v365_v48  ;;  %v372_v51 = vpop.permute.xlu0 %371 }
 0x116   : > { %451 = vmatprep.subr.bf16.mxu0 %v656_v2  ;;  %v378_v55 = vsel %vm375_vm5, %v372_v51, %v374_v50 }
 0x117   : > { %v384_v58 = vmul.bf16 %v383_v52, %v378_v55 }
 0x119   : > { %v388_v56 = vpop.permute.xlu1 %387  ;;  %v386_v57 = vpop.permute.xlu0 %385  ;;  %452 = vmatpush1.bf16.msra.mxu0 %v370_v54 }
 0x11a   : > { %453 = vmatprep.subr.bf16.mxu0 %v656_v2  ;;  %v392_v60 = vsel %vm389_vm6, %v386_v57, %v388_v56 }
 0x11b   : > { %v398_v0 = vmul.bf16 %v397_v59, %v392_v60 }
 0x11d   : > { %v402_v62 = vpop.permute.xlu1 %401  ;;  %v400_v63 = vpop.permute.xlu0 %399  ;;  %454 = vmatpush1.bf16.msra.mxu0 %v384_v58 }
 0x11e   : > { %455 = vmatprep.subr.bf16.mxu0 %v656_v2  ;;  %v406_v4 = vsel %vm403_vm7, %v400_v63, %v402_v62 }
 0x11f   : > { %v412_v7 = vmul.bf16 %v411_v1, %v406_v4 }
 0x121   : > { %v416_v5 = vpop.permute.xlu1 %415  ;;  %v414_v6 = vpop.permute.xlu0 %413  ;;  %456 = vmatpush1.bf16.msra.mxu0 %v398_v0 }
 0x122   : > { %457 = vmatprep.subr.bf16.mxu0 %v656_v2  ;;  %v420_v9 = vsel %vm417_vm8, %v414_v6, %v416_v5 }
 0x123   : > { %v429_v10 = vmul.bf16 %v428_v8, %v420_v9 }
 0x125   : > { %458 = vmatpush1.bf16.msra.mxu0 %v412_v7 }
 0x126   : > { %459 = vmatprep.subr.bf16.mxu0 %v656_v2 }
 0x129   : > { %460 = vmatpush1.bf16.msra.mxu0 %v429_v10 }
 0x12c   : > { %476 = vmatmul.mubr.bf16.vlgmr.msra.gmra.mrb[0].mxu0 %v645_v11 }
 0x1ff   : > { %v477_v12 = vpop.f32.mrb[0].mxu0 }
 0x200   : > { %v612_v13 = vpack.c.bf16 %v477_v12, %v477_v12  ;;  %v479_v14 = vpop.f32.mrb[1].mxu0 }
 0x201   : > { %v480_v15 = vpop.f32.mrb[2].mxu0 }
 0x202   : > { %493 = vst.msk [vmem:[%s258_s15] sm:$0xf] %vm492_vm9, %v612_v13  ;;  %v484_v16 = vpack.c.bf16 %v480_v15, %v477_v12  ;;  %v613_v2 = vpack.c.bf16 %v480_v15, %v480_v15  ;;  %v482_v17 = vpop.f32.mrb[3].mxu0 }
 0x204   : > { %494 = vst.msk [vmem:[%s258_s15 + $0x4] sm:$0xf] %vm492_vm9, %v613_v2  ;;  %v495_v18 = vunpack.c.l.bf16 %v484_v16 }
 0x206   : > { %v497_v19 = vsel %vm496_vm10, %v495_v18, 0.0  ;;  %v500_v20 = vmul.f32 %v495_v18, %v495_v18 }
 0x207   : > { %498 = vadd.xlane.f32.xlu0 %v497_v19 }
 0x208   : > { %v501_v21 = vsel %vm496_vm10, %v500_v20, 0.0 }
 0x209   : > { %502 = vadd.xlane.f32.xlu1 %v501_v21 }
 0x294   : > { %v499_v22 = vpop.xlane.xlu0 %498 }
 0x296   : > { %v503_v23 = vpop.xlane.xlu1 %502 }
 0x297   : > { %v504_v24 = vsel %vm356_vm4, %v499_v22, %v503_v23 }
 0x298   : > { %506 = vst.msk [vmem:[%s262_s18] sm:$0xff] %vm505_vm11, %v504_v24 }
 0x299 PF: > { %s17_s21 = sadd.s32 1, %s654_s21  }
 0x29a   : > { %p14_p4 = scmp.ge.s32.totalorder %s17_s21, 4  }
 0x29c   :  { %16 = sbr.rel (!%p14_p4) target bundleno = 1 (0x1), region = 82 }

</bundles_post_ra>
